<compile_context>
chip_gen: v6e
topology: v6e:2x2x1
jax: 0.10.0
libtpu: 0.0.40
codegen_flags: <defaults>
</compile_context>

<pallas_src>
import jax
import jax.numpy as jnp
from jax.experimental import pallas as pl
from jax.experimental.pallas import tpu as pltpu


def _bw_to_3ch_kernel(x_ref, o_ref):
    # x_ref: (bb, M)    single-channel block, lane-dense along M = H*W
    # o_ref: (bb, 3*M)  flat three-channel output block (channel-major)
    x = x_ref[...]
    m = x_ref.shape[1]
    # Three lane-dense static-slice stores; the loaded vregs are reused for
    # each store (no 3x-sized intermediate, no masked partial stores when
    # M is a multiple of 128).
    o_ref[:, 0 * m:1 * m] = x
    o_ref[:, 1 * m:2 * m] = x
    o_ref[:, 2 * m:3 * m] = x


# Per-step footprint target: 2 buffers x (input bb*M + output bb*3*M) elems.
_VMEM_BUDGET_BYTES = 10 * 1024 * 1024   # fits v5e's 16 MiB default with headroom
_MIN_GRID_STEPS = 8                      # keep pipeline busy / let v7x's 2 TCs shard
_BYPASS_BYTES = 256 * 1024               # below this, XLA-fused broadcast wins


def _pick_block_rows(B, M, itemsize):
    """Largest batch-row block (multiple of 8) under the VMEM budget,
    additionally capped so the grid has >= _MIN_GRID_STEPS steps when B allows."""
    if B <= 8:
        return B  # block == full batch dim -> sublane rule satisfied directly
    max_rows = _VMEM_BUDGET_BYTES // (2 * 4 * M * itemsize)  # 2 bufs x (1+3) rows
    rows_for_steps = -(-B // _MIN_GRID_STEPS)                # cdiv(B, min_steps)
    bb = min(max_rows, rows_for_steps, B)
    bb = max(8, (bb // 8) * 8)
    return min(bb, B)


def bw_1_to_3ch_pallas(x, *, force_pallas=False):
    """Repeat a single channel to 3 channels (NCHW) via a Pallas kernel.

    x: [B, 1, H, W] or [B, H, W]; returns [B, 3, H, W] with x's dtype.
    """
    if x.ndim == 3:
        x = x[:, None, :, :]
    B, C, H, W = x.shape
    if C != 1:
        raise ValueError(f"expected single-channel input, got C={C}")
    M = H * W
    itemsize = x.dtype.itemsize

    out_bytes = B * 3 * M * itemsize
    if not force_pallas and out_bytes < _BYPASS_BYTES:
        # Tiny input: launch + per-step overhead dwarfs HBM time; let XLA fuse.
        return jnp.broadcast_to(x, (B, 3, H, W))

    bb = _pick_block_rows(B, M, itemsize)
    per_step_bytes = 2 * (bb * M + bb * 3 * M) * itemsize
    if per_step_bytes > 14 * 1024 * 1024 and not force_pallas:
        # A single spatial slice is too large for a safe VMEM footprint;
        # fall back to the always-correct fused XLA broadcast.
        return jnp.broadcast_to(x, (B, 3, H, W))

    x2 = x.reshape(B, M)  # lane-dense flatten (free, contiguous)
    grid = (pl.cdiv(B, bb),)

    out = pl.pallas_call(
        _bw_to_3ch_kernel,
        out_shape=jax.ShapeDtypeStruct((B, 3 * M), x.dtype),
        grid=grid,
        in_specs=[pl.BlockSpec((bb, M), lambda i: (i, 0))],
        out_specs=pl.BlockSpec((bb, 3 * M), lambda i: (i, 0)),
        compiler_params=pltpu.CompilerParams(
            dimension_semantics=("parallel",)
        ),
    )(x2)
    # (B, 3*M) -> (B, 3, H, W) is a contiguous (free) reshape.
    return out.reshape(B, 3, H, W)


def bw_1_to_3ch(x, data_format="NCHW"):
    if data_format == "NCHW":
        return bw_1_to_3ch_pallas(x)
    elif data_format == "NHWC":
        # No transpose round-trip: channel-last repeat is left to a fused XLA
        # broadcast (saves ~3x HBM traffic vs transposing to NCHW and back).
        # TODO(synk): native NHWC Pallas kernel (lane-repeat on a [B*H, W*3] view).
        if x.ndim == 3:
            x = x[..., None]
        B, H, W, C = x.shape
        if C != 1:
            raise ValueError(f"expected single-channel input, got C={C}")
        return jnp.broadcast_to(x, (B, H, W, 3))
    else:
        raise ValueError(f"unsupported data_format: {data_format}")


def bw_one_to_three_ch(t, data_format="NCHW", include_label=False):
    """BWOneToThreeCh.forward: expand t[0] (and optionally t[1]) to 3 channels."""
    l = list(t)
    l[0] = bw_1_to_3ch(l[0], data_format)
    if include_label:
        l[1] = bw_1_to_3ch(l[1], data_format)
    return tuple(l)


if __name__ == "__main__":
    key = jax.random.PRNGKey(0)
    kx, ky, kz = jax.random.split(key, 3)

    # ---- module-shaped tiny case: B=2, 1x16x16 image, int label passthrough ----
    B, H, W = 2, 16, 16
    x = jax.random.normal(kx, (B, 1, H, W), dtype=jnp.float32)
    y = jax.random.randint(ky, (B, H, W), minval=0, maxval=4, dtype=jnp.int32)
    x_ref = jnp.concatenate([x, x, x], axis=1)

    # Default config (include_label=False): only the image is expanded.
    out = bw_one_to_three_ch((x, y))
    jax.block_until_ready(out)
    x3, y_out = out
    assert x3.shape == (B, 3, H, W) and x3.dtype == x.dtype
    assert bool(jnp.all(x3 == x_ref))
    assert bool(jnp.all(y_out == y))

    # Force the Pallas kernel path on the same tiny input (kernel must run).
    x3_k = bw_1_to_3ch_pallas(x, force_pallas=True)
    jax.block_until_ready(x3_k)
    assert x3_k.shape == (B, 3, H, W) and x3_k.dtype == x.dtype
    assert bool(jnp.all(x3_k == x_ref))

    # include_label=True: single-channel float label is expanded too.
    y_f = y[:, None, :, :].astype(jnp.float32)
    out2 = bw_one_to_three_ch((x, y_f), include_label=True)
    jax.block_until_ready(out2)
    _, y3 = out2
    assert y3.shape == (B, 3, H, W)
    assert bool(jnp.all(y3 == jnp.concatenate([y_f, y_f, y_f], axis=1)))

    # ---- multi-step grid with a ragged last block (odd B), forced Pallas ----
    B2, H2, W2 = 10, 32, 32
    z = jax.random.normal(kz, (B2, 1, H2, W2), dtype=jnp.float32)
    z3 = bw_1_to_3ch_pallas(z, force_pallas=True)
    jax.block_until_ready(z3)
    assert z3.shape == (B2, 3, H2, W2)
    assert bool(jnp.all(z3 == jnp.concatenate([z, z, z], axis=1)))

    # NHWC branch (fused XLA broadcast, no transpose round-trip).
    x_nhwc = jnp.transpose(x, (0, 2, 3, 1))
    x3_nhwc = bw_1_to_3ch(x_nhwc, data_format="NHWC")
    jax.block_until_ready(x3_nhwc)
    assert bool(jnp.all(jnp.transpose(x3_nhwc, (0, 3, 1, 2)) == x_ref))

    print("KERNEL_OK")
</pallas_src>

<mosaic_0001>
module attributes {stable_mosaic.version = 11 : i64} {
  func.func @_bw_to_3ch_kernel(%arg0: i32, %arg1: memref<2x256xf32, #tpu.memory_space<vmem>>, %arg2: memref<2x768xf32, #tpu.memory_space<vmem>>) attributes {dimension_semantics = [#tpu.dimension_semantics<parallel>], iteration_bounds = array<i64: 1>, scalar_prefetch = 0 : i64, scratch_operands = 0 : i64, tpu.core_type = #tpu.core_type<tc>, window_params = [{transform_indices = @transform_0, window_bounds = array<i64: 2, 256>}, {transform_indices = @transform_1, window_bounds = array<i64: 2, 768>}]} {
    %c0 = arith.constant 0 : index
    %c0_0 = arith.constant 0 : index
    %0 = vector.load %arg1[%c0, %c0_0] : memref<2x256xf32, #tpu.memory_space<vmem>>, vector<2x256xf32>
    %c0_1 = arith.constant 0 : index
    %c0_2 = arith.constant 0 : index
    %1 = vector.load %arg2[%c0_1, %c0_2] : memref<2x768xf32, #tpu.memory_space<vmem>>, vector<2x256xf32>
    tpu.vector_store %arg2[%c0_1, %c0_2], %0 {strides = array<i32>} : memref<2x768xf32, #tpu.memory_space<vmem>>, vector<2x256xf32>,
    %c0_3 = arith.constant 0 : index
    %c256 = arith.constant 256 : index
    %2 = vector.load %arg2[%c0_3, %c256] : memref<2x768xf32, #tpu.memory_space<vmem>>, vector<2x256xf32>
    tpu.vector_store %arg2[%c0_3, %c256], %0 {strides = array<i32>} : memref<2x768xf32, #tpu.memory_space<vmem>>, vector<2x256xf32>,
    %c0_4 = arith.constant 0 : index
    %c512 = arith.constant 512 : index
    %3 = vector.load %arg2[%c0_4, %c512] : memref<2x768xf32, #tpu.memory_space<vmem>>, vector<2x256xf32>
    tpu.vector_store %arg2[%c0_4, %c512], %0 {strides = array<i32>} : memref<2x768xf32, #tpu.memory_space<vmem>>, vector<2x256xf32>,
    return
  }
  func.func @transform_0(%arg0: i32) -> (i32, i32) {
    %c0_i32 = arith.constant 0 : i32
    %c0_i32_0 = arith.constant 0 : i32
    return %arg0, %c0_i32 : i32, i32
  }
  func.func @transform_1(%arg0: i32) -> (i32, i32) {
    %c0_i32 = arith.constant 0 : i32
    %c0_i32_0 = arith.constant 0 : i32
    return %arg0, %c0_i32 : i32, i32
  }
}

</mosaic_0001>

<bundles_post_ra>
// kernel: tpu_custom_call.1
= control target key start
LH: loop header
LB: loop body
LE: loop exit
PB: predicated region body
PF: predicated region fallthrough
CT: control target
= control target key end

     0   :  { %6 = vsyncpa [#allocation3], 0  ;;  %s104_s0 = inlined_call_operand.hbm [shape: f32[2,256], index: 0, kind: input, shape index: {}]   ;;  %s105_s1 = inlined_call_operand.hbm [shape: f32[2,768], index: 1, kind: output, shape index: {}]  }
   0x1   :  { %7 = vsyncpa [#allocation4], 0  ;;  %s86_s6 = smov [#allocation2]  }
   0x2   :  { %s14_s7 = sshll.u32 %s86_s6, 4  ;;  %s15_s7 = int_to_ptr.vmem [resolvable:$true] %s14_s7 }
   0x3   :  { %s50_s8 = scalar_lea.vmem %s15_s7, 64  ;;  %p55_p1 = scmp.lt.s32.totalorder %s15_s7, %s15_s7 }
   0x4   :  { %p51_p0 = scmp.ne.s32.totalorder %s15_s7, %s50_s8  ;;  %p56_p2 = scmp.lt.s32.totalorder %s50_s8, %s50_s8 }
   0x6   :  { %p57_p3 = por %p56_p2, %p55_p1 }
   0x8   :  { %p58_p4 = pnand %p57_p3, %p51_p0 }
   0xa   :  { %61 = shalt.err (!%p58_p4)
}
   0xb   :  { %17 = dma.hbm_to_vmem [thread:$0]  %s104_s0, 64, %s15_s7, [#allocation3]  }
   0xc   :  { %82 = dma.done.wait [#allocation3], 64  }
   0xd   :  { %83 = vsyncadd [#allocation3], 4294967232  ;;  %s87_s11 = smov [#allocation5]   ;;  %v21_v0 = vld [vmem:[#allocation2] sm:$0xf] }
   0xe   :  { %s31_s12 = sshll.u32 %s87_s11, 4  ;;  %22 = vst [vmem:[#allocation5] sm:$0xf] %v21_v0  ;;  %23 = vst [vmem:[#allocation5 + $0x4] sm:$0xf] %v21_v0  ;;  %s32_s12 = int_to_ptr.vmem [resolvable:$true] %s31_s12 }
   0xf   :  { %24 = vst [vmem:[#allocation5 + $0x8] sm:$0xf] %v21_v0  ;;  %s62_s13 = scalar_lea.vmem %s32_s12, 192  ;;  %p67_p6 = scmp.lt.s32.totalorder %s32_s12, %s32_s12 }
  0x10   :  { %p63_p5 = scmp.ne.s32.totalorder %s32_s12, %s62_s13  ;;  %p68_p7 = scmp.lt.s32.totalorder %s62_s13, %s62_s13 }
  0x12   :  { %p69_p8 = por %p68_p7, %p67_p6 }
  0x14   :  { %p70_p9 = pnand %p69_p8, %p63_p5 }
  0x16   :  { %73 = shalt.err (!%p70_p9)
}
  0x17   :  { %34 = dma.vmem_to_hbm [thread:$0]  %s32_s12, 192, %s105_s1, [#allocation4]  }
  0x18   :  { %84 = dma.done.wait [#allocation4], 192  }
  0x19   :  { %85 = vsyncadd [#allocation4], 4294967104 }
  0x1a   :  { %38 = vsyncpa [#allocation3], 1 }
  0x1b   :  { %39 = vsyncpa [#allocation4], 1 }

</bundles_post_ra>
